<compile_context>
chip_gen: v6e
topology: v6e:2x2x1
jax: 0.10.0
libtpu: 0.0.40
codegen_flags: <defaults>
</compile_context>

<pallas_src>
import jax
import jax.numpy as jnp
from jax.experimental import pallas as pl
from jax.experimental.pallas import tpu as pltpu


def _unpool_kernel(x_ref, perm_ref, out_ref):
    """out_ref[r, :] = x_ref[i, :] where perm_ref[0, i] == r0 + r, else 0.

    x_ref    : (N, Fp)  pooled node features (whole array, VMEM resident)
    perm_ref : (1, N)   int32 kept-row indices (whole array, VMEM resident)
    out_ref  : (T, Fp)  current row tile of the unpooled output
    """
    tile_rows = out_ref.shape[0]
    n = x_ref.shape[0]
    row0 = pl.program_id(0) * tile_rows
    # Shift perm into this tile's local frame (cheap (1, N) op) and compare
    # against a (T, N) row iota — avoids a full (T, N) VALU add per tile.
    local = perm_ref[...] - row0
    sel = (
        jax.lax.broadcasted_iota(jnp.int32, (tile_rows, n), 0) == local
    ).astype(x_ref.dtype)
    # Each output row has at most one non-zero selection entry, so the result
    # is an exact copy (or exact zero) of the corresponding x row.
    out_ref[...] = jnp.dot(
        sel, x_ref[...], preferred_element_type=jnp.float32
    ).astype(out_ref.dtype)


def _choose_row_tile(original_size: int, requested) -> int:
    """Row tile: full-extent block for small outputs, fixed 512 (multiple of 8)
    with a cdiv grid (padded/clipped last block) otherwise."""
    if requested is None:
        requested = 512
    if requested >= original_size:
        return original_size  # single full-extent block (always layout-legal)
    return max(8, (requested // 8) * 8)  # keep the (8, 128) sublane rule


def graph_unpooling(x, perm, original_size, *, row_tile=None):
    """Pallas implementation of GraphUnpooling.forward (x: (N, F), perm: (N,))."""
    n, f = x.shape

    # Lane-dense output: pad features up to a multiple of 128 so every store
    # is an unmasked full-lane vst and the MXU output tile is fully used.
    f_pad = (-f) % 128
    xp = jnp.pad(x, ((0, 0), (0, f_pad))) if f_pad else x
    fp = f + f_pad

    tile = _choose_row_tile(original_size, row_tile)
    grid = (pl.cdiv(original_size, tile),)
    perm2d = perm.astype(jnp.int32).reshape(1, n)

    # VMEM budget: double-buffered x + perm + double-buffered output tile,
    # with 2x headroom; clamp to [32 MiB, 64 MiB] (safe on v5e/v6e/v7x).
    itemsize = xp.dtype.itemsize
    needed = 2 * (n * fp * itemsize) + 2 * (n * 4) + 2 * (tile * fp * itemsize)
    vmem_limit = int(min(64 * 1024 * 1024, max(32 * 1024 * 1024, 2 * needed)))

    out = pl.pallas_call(
        _unpool_kernel,
        out_shape=jax.ShapeDtypeStruct((original_size, fp), x.dtype),
        grid=grid,
        in_specs=[
            pl.BlockSpec((n, fp), lambda i: (0, 0)),  # x: DMA'd to VMEM once
            pl.BlockSpec((1, n), lambda i: (0, 0)),   # perm: DMA'd to VMEM once
        ],
        out_specs=pl.BlockSpec((tile, fp), lambda i: (i, 0)),
        compiler_params=pltpu.CompilerParams(
            dimension_semantics=("parallel",),
            vmem_limit_bytes=vmem_limit,
        ),
    )(xp, perm2d)

    return out[:, :f] if f_pad else out


# ---------------------------------------------------------------------------
# pure-JAX reference (for correctness checking only)
# ---------------------------------------------------------------------------
def graph_unpooling_ref(x, perm, original_size):
    out = jnp.zeros((original_size, x.shape[1]), x.dtype)
    return out.at[perm].set(x)


if __name__ == "__main__":
    key = jax.random.PRNGKey(0)
    kx, kpa, kpb, kpc, kpd = jax.random.split(key, 5)

    # Shapes implied by the module: x = [num_kept_nodes, num_features].
    n_kept, feat = 8, 32
    x = jax.random.normal(kx, (n_kept, feat), jnp.float32)

    def check(out, ref, name):
        assert out.shape == ref.shape, name
        assert jnp.allclose(out, ref, rtol=1e-6, atol=1e-6), name

    # Config A: original_size = 16 -> single full-extent output block.
    perm_a = jax.random.permutation(kpa, 16)[:n_kept].astype(jnp.int32)
    out_a = jax.block_until_ready(graph_unpooling(x, perm_a, 16))
    check(out_a, graph_unpooling_ref(x, perm_a, 16), "config A mismatch")

    # Config B: original_size = 24, row_tile = 8 -> 3-step parallel grid.
    perm_b = jax.random.permutation(kpb, 24)[:n_kept].astype(jnp.int32)
    out_b = jax.block_until_ready(graph_unpooling(x, perm_b, 24, row_tile=8))
    check(out_b, graph_unpooling_ref(x, perm_b, 24), "config B mismatch")

    # Config C: original_size = 10 (not a multiple of 8) -> single full block.
    perm_c = jax.random.permutation(kpc, 10)[:n_kept].astype(jnp.int32)
    out_c = jax.block_until_ready(graph_unpooling(x, perm_c, 10))
    check(out_c, graph_unpooling_ref(x, perm_c, 10), "config C mismatch")

    # Config D: original_size = 600 -> cdiv grid (tile 512, clipped last block).
    perm_d = jax.random.permutation(kpd, 600)[:n_kept].astype(jnp.int32)
    out_d = jax.block_until_ready(graph_unpooling(x, perm_d, 600))
    check(out_d, graph_unpooling_ref(x, perm_d, 600), "config D mismatch")

    # Config E: bf16 features -> bf16 selection matrix / bf16 MXU path.
    x_bf = x.astype(jnp.bfloat16)
    out_e = jax.block_until_ready(graph_unpooling(x_bf, perm_a, 16))
    check(out_e, graph_unpooling_ref(x_bf, perm_a, 16), "config E mismatch")

    print("KERNEL_OK")
</pallas_src>

<mosaic_0001>
module attributes {stable_mosaic.version = 11 : i64} {
  func.func @_unpool_kernel(%arg0: i32, %arg1: memref<8x128xf32, #tpu.memory_space<vmem>>, %arg2: memref<1x8xi32, #tpu.memory_space<vmem>>, %arg3: memref<16x128xf32, #tpu.memory_space<vmem>>) attributes {dimension_semantics = [#tpu.dimension_semantics<parallel>], iteration_bounds = array<i64: 1>, scalar_prefetch = 0 : i64, scratch_operands = 0 : i64, tpu.core_type = #tpu.core_type<tc>, window_params = [{pipeline_mode = #tpu.pipeline_mode<synchronous>, transform_indices = @transform_0, window_bounds = array<i64: 8, 128>}, {pipeline_mode = #tpu.pipeline_mode<synchronous>, transform_indices = @transform_1, window_bounds = array<i64: 1, 8>}, {transform_indices = @transform_2, window_bounds = array<i64: 16, 128>}]} {
    %c16_i32 = arith.constant 16 : i32
    %0 = arith.muli %arg0, %c16_i32 : i32
    %c0 = arith.constant 0 : index
    %c0_0 = arith.constant 0 : index
    %1 = vector.load %arg2[%c0, %c0_0] : memref<1x8xi32, #tpu.memory_space<vmem>>, vector<1x8xi32>
    %2 = vector.broadcast %0 : i32 to vector<1x8xi32>
    %3 = arith.subi %1, %2 : vector<1x8xi32>
    %4 = tpu.iota {dimensions = array<i32: 0>} : vector<16x8xi32>
    %5 = vector.broadcast %3 : vector<1x8xi32> to vector<16x8xi32>
    %6 = arith.cmpi eq, %4, %5 : vector<16x8xi32>
    %7 = arith.extui %6 : vector<16x8xi1> to vector<16x8xi32>
    %8 = arith.sitofp %7 : vector<16x8xi32> to vector<16x8xf32>
    %c0_1 = arith.constant 0 : index
    %c0_2 = arith.constant 0 : index
    %9 = vector.load %arg1[%c0_1, %c0_2] : memref<8x128xf32, #tpu.memory_space<vmem>>, vector<8x128xf32>
    %cst = arith.constant dense<0.000000e+00> : vector<16x128xf32>
    %10 = tpu.matmul %8, %9, %cst {dimension_numbers = #tpu.dot_dimension_numbers<[1], [0], [0], [1], [0, 0, 1, 1], [], []>} : vector<16x8xf32>, vector<8x128xf32>, vector<16x128xf32> -> vector<16x128xf32>
    %c0_3 = arith.constant 0 : index
    %c0_4 = arith.constant 0 : index
    %11 = vector.load %arg3[%c0_3, %c0_4] : memref<16x128xf32, #tpu.memory_space<vmem>>, vector<16x128xf32>
    tpu.vector_store %arg3[%c0_3, %c0_4], %10 {strides = array<i32>} : memref<16x128xf32, #tpu.memory_space<vmem>>, vector<16x128xf32>,
    return
  }
  func.func @transform_0(%arg0: i32) -> (i32, i32) {
    %c0_i32 = arith.constant 0 : i32
    %c0_i32_0 = arith.constant 0 : i32
    %c0_i32_1 = arith.constant 0 : i32
    return %c0_i32, %c0_i32_0 : i32, i32
  }
  func.func @transform_1(%arg0: i32) -> (i32, i32) {
    %c0_i32 = arith.constant 0 : i32
    %c0_i32_0 = arith.constant 0 : i32
    %c0_i32_1 = arith.constant 0 : i32
    return %c0_i32, %c0_i32_0 : i32, i32
  }
  func.func @transform_2(%arg0: i32) -> (i32, i32) {
    %c0_i32 = arith.constant 0 : i32
    %c0_i32_0 = arith.constant 0 : i32
    return %arg0, %c0_i32 : i32, i32
  }
}

</mosaic_0001>

<bundles_post_ra>
// kernel: tpu_custom_call.1
= control target key start
LH: loop header
LB: loop body
LE: loop exit
PB: predicated region body
PF: predicated region fallthrough
CT: control target
= control target key end

     0   :  { %7 = vsyncpa [#allocation3], 0  ;;  %s234_s0 = inlined_call_operand.hbm [shape: f32[8,128], index: 0, kind: input, shape index: {}]   ;;  %s235_s1 = inlined_call_operand.vmem [shape: s32[1,8], index: 1, kind: input, shape index: {}]   ;;  %s236_s2 = inlined_call_operand.hbm [shape: f32[16,128], index: 2, kind: output, shape index: {}]  }
   0x1   :  { %8 = vsyncpa [#allocation4], 0  ;;  %s205_s9 = smov [#allocation2]  }
   0x2   :  { %s15_s10 = sshll.u32 %s205_s9, 4  ;;  %s16_s10 = int_to_ptr.vmem [resolvable:$true] %s15_s10 }
   0x3   :  { %s169_s11 = scalar_lea.vmem %s16_s10, 128  ;;  %p174_p1 = scmp.lt.s32.totalorder %s16_s10, %s16_s10 }
   0x4   :  { %p170_p0 = scmp.ne.s32.totalorder %s16_s10, %s169_s11  ;;  %p175_p2 = scmp.lt.s32.totalorder %s169_s11, %s169_s11 }
   0x6   :  { %p176_p3 = por %p175_p2, %p174_p1 }
   0x8   :  { %p177_p4 = pnand %p176_p3, %p170_p0 }
   0xa   :  { %180 = shalt.err (!%p177_p4)
}
   0xb   :  { %18 = dma.hbm_to_vmem [thread:$0]  %s234_s0, 128, %s16_s10, [#allocation3]  }
   0xc   :  { %201 = dma.done.wait [#allocation3], 128  }
   0xd   :  { %202 = vsyncadd [#allocation3], 4294967168  ;;  %v28_v0 = vlaneseq  ;;  %v41_v3 = vld [vmem:[#allocation2] sm:$0xff]  ;;  %vm42_vm0 = vcmask 64512   ;;  %v206_v5 = vmov 0.0   ;;  %s207_s0 = smov [#allocation5]  }
   0xe   :  { %v143_v4 = vld [vmem:[%s235_s1] ss:$0 sm:$0xff]  ;;  %151 = vmatprep.subr.mxu0 %v41_v3  ;;  %s131_s16 = sshll.u32 %s207_s0, 4  ;;  %s132_s16 = int_to_ptr.vmem [resolvable:$true] %s131_s16 }
   0xf   :  { %v29_v1 = vshrl.u32 %v28_v0, 7  ;;  %152 = vmatpush3.msra.mxu0 %v41_v3  ;;  %s181_s17 = scalar_lea.vmem %s132_s16, 256  ;;  %p186_p6 = scmp.lt.s32.totalorder %s132_s16, %s132_s16 }
  0x10   :  { %p182_p5 = scmp.ne.s32.totalorder %s132_s16, %s181_s17  ;;  %p187_p7 = scmp.lt.s32.totalorder %s181_s17, %s181_s17 }
  0x11   :  { %v30_v2 = vadd.s32 8, %v29_v1  ;;  %vm35_vm1 = vcmp.eq.s32.totalorder %v29_v1, %v143_v4 }
  0x12   :  { %v144_v6 = vsel %vm35_vm1, 1.0, %v206_v5  ;;  %p188_p8 = por %p187_p7, %p186_p6 }
  0x13   :  { %vm36_vm2 = vcmp.eq.s32.totalorder %v30_v2, %v143_v4  ;;  %153 = vmatprep.mubr.msk.f32.mxu0 %vm42_vm0, %v144_v6 }
  0x14   :  { %v145_v7 = vsel %vm36_vm2, 1.0, %v206_v5  ;;  %p189_p9 = pnand %p188_p8, %p182_p5 }
  0x15   :  { %154 = vmatmul.mubr.msk.f32.vlgmr.msra.gmra.mxu0 %vm42_vm0, %v145_v7 }
  0xd5   :  { %v155_v8 = vpop.f32.mrf.mxu0 }
  0xd6   :  { %125 = vst [vmem:[#allocation5 + $0x8] sm:$0xff] %v155_v8 }
  0xd7   :  { %v115_v9 = vpop.f32.mrf.mxu0 }
  0xd8   :  { %124 = vst [vmem:[#allocation5] sm:$0xff] %v115_v9 }
  0xd9   :  { %192 = shalt.err (!%p189_p9)
}
  0xda   :  { %s208_s1 = smov 128   ;;  %s209_s18 = smov 8  }
  0xdb   :  { %137 = dma.vmem_to_hbm [thread:$0]  %s132_s16, 256, %s236_s2, [#allocation4], %s208_s1, %s208_s1, %s209_s18  }
  0xdc   :  { %203 = dma.done.wait [#allocation4], 256  }
  0xdd   :  { %204 = vsyncadd [#allocation4], 4294967040 }
  0xde   :  { %141 = vsyncpa [#allocation3], 1 }
  0xdf   :  { %142 = vsyncpa [#allocation4], 1 }

</bundles_post_ra>
